<compile_context>
chip_gen: v7x
topology: tpu7x:2x2x1
jax: 0.10.0
libtpu: 0.0.40
codegen_flags: <defaults>
</compile_context>

<pallas_src>
import functools

import jax
import jax.numpy as jnp
from jax.experimental import pallas as pl
from jax.experimental.pallas import tpu as pltpu

_IN = 784          # 28 * 28
_HID = 100         # true hidden width
_OUT = 10          # true number of classes
_HID_P = 128       # lane-padded hidden width
_OUT_P = 128       # lane-padded class width
_NEG = -1.0e30     # bias for padded logit columns -> exp() underflows to 0


def _round_up(x, m):
    return (x + m - 1) // m * m


def _mlp_kernel(x_ref, w1_ref, b1_ref, w2_ref, b2_ref, w3_ref, b3_ref, o_ref):
    """One [TB, 784] batch tile of the forward pass.

    x_ref:  [TB, 784]      bf16
    w1_ref: [784, 128]     bf16   b1_ref: [1, 128] f32
    w2_ref: [128, 128]     bf16   b2_ref: [1, 128] f32
    w3_ref: [128, 128]     bf16   b3_ref: [1, 128] f32 (padded cols = -1e30)
    o_ref:  [TB, 128]      f32    (log-probabilities; cols >= 10 are junk, sliced off)
    """
    x = x_ref[...]  # bf16, fed straight to the MXU (no upcast copy)

    # fc1 + ReLU (bf16 operands, f32 accumulation)
    h1 = jnp.dot(x, w1_ref[...], preferred_element_type=jnp.float32) + b1_ref[...]
    h1 = jnp.maximum(h1, 0.0)

    # fc2 + ReLU
    h2 = jnp.dot(h1.astype(jnp.bfloat16), w2_ref[...],
                 preferred_element_type=jnp.float32) + b2_ref[...]
    h2 = jnp.maximum(h2, 0.0)

    # fc3 (padded columns get logit ~ -1e30 via the bias)
    logits = jnp.dot(h2.astype(jnp.bfloat16), w3_ref[...],
                     preferred_element_type=jnp.float32) + b3_ref[...]

    # log_softmax over the last dim (numerically stable, f32).
    # exp(-1e30 - m) == 0, so padded columns contribute nothing to the denominator.
    m = jnp.max(logits, axis=-1, keepdims=True)
    shifted = logits - m
    lse = jnp.log(jnp.sum(jnp.exp(shifted), axis=-1, keepdims=True))
    o_ref[...] = (shifted - lse).astype(o_ref.dtype)


@functools.partial(jax.jit, static_argnames=("tb",))
def fc3_forward(x, params, tb=512):
    """x: [N, 1, 28, 28] float32 -> [N, 10] float32 log-probabilities."""
    n = x.shape[0]
    x_flat = x.reshape(n, _IN)  # nn.Flatten()

    # Batch tile: multiple of 8 (sublane), clamped so tiny test batches don't over-pad.
    tb = min(tb, _round_up(n, 8))
    n_pad = _round_up(n, tb)
    if n_pad != n:
        x_flat = jnp.pad(x_flat, ((0, n_pad - n), (0, 0)))

    w1, b1, w2, b2, w3, b3 = params

    # Pad hidden / class dims to 128 lanes (weights are tiny -> negligible cost),
    # cast the MXU operands to bf16; biases stay f32.
    dh = _HID_P - _HID
    dc = _OUT_P - _OUT
    w1p = jnp.pad(w1, ((0, 0), (0, dh))).astype(jnp.bfloat16)           # [784, 128]
    b1p = jnp.pad(b1, ((0, 0), (0, dh)))                                # [1, 128]
    w2p = jnp.pad(w2, ((0, dh), (0, dh))).astype(jnp.bfloat16)          # [128, 128]
    b2p = jnp.pad(b2, ((0, 0), (0, dh)))                                # [1, 128]
    w3p = jnp.pad(w3, ((0, dh), (0, dc))).astype(jnp.bfloat16)          # [128, 128]
    b3p = jnp.pad(b3, ((0, 0), (0, dc)), constant_values=_NEG)          # [1, 128]

    x_bf = x_flat.astype(jnp.bfloat16)

    grid = (n_pad // tb,)

    # Weights/biases: full-shape blocks with a constant index_map -> VMEM-resident.
    resident = lambda shape: pl.BlockSpec(shape, lambda i: tuple(0 for _ in shape))

    out = pl.pallas_call(
        _mlp_kernel,
        out_shape=jax.ShapeDtypeStruct((n_pad, _OUT_P), jnp.float32),
        grid=grid,
        in_specs=[
            pl.BlockSpec((tb, _IN), lambda i: (i, 0)),  # streamed, double-buffered
            resident(w1p.shape),
            resident(b1p.shape),
            resident(w2p.shape),
            resident(b2p.shape),
            resident(w3p.shape),
            resident(b3p.shape),
        ],
        out_specs=pl.BlockSpec((tb, _OUT_P), lambda i: (i, 0)),  # lane-dense store
        compiler_params=pltpu.CompilerParams(
            dimension_semantics=("parallel",),          # shard batch across TCs (v7x)
            vmem_limit_bytes=32 * 1024 * 1024,          # tight limit w/ headroom
        ),
    )(x_bf, w1p, b1p, w2p, b2p, w3p, b3p)

    return out[:n, :_OUT]


def init_params(key):
    """Deterministic init matching PyTorch nn.Linear default:
    weight, bias ~ U(-1/sqrt(fan_in), 1/sqrt(fan_in)).
    Weights stored as [in, out]; biases as [1, out] (2D for TPU layout)."""
    dims = [(_IN, _HID), (_HID, _HID), (_HID, _OUT)]
    params = []
    for (fan_in, fan_out) in dims:
        key, kw, kb = jax.random.split(key, 3)
        bound = 1.0 / jnp.sqrt(jnp.float32(fan_in))
        w = jax.random.uniform(kw, (fan_in, fan_out), jnp.float32, -bound, bound)
        b = jax.random.uniform(kb, (1, fan_out), jnp.float32, -bound, bound)
        params.extend([w, b])
    return tuple(params)


def _reference(x, params):
    """Pure-JAX reference using the same bf16-in / f32-accum matmul recipe."""
    w1, b1, w2, b2, w3, b3 = params
    h = x.reshape(x.shape[0], _IN).astype(jnp.bfloat16)
    h = jnp.maximum(
        jnp.dot(h, w1.astype(jnp.bfloat16), preferred_element_type=jnp.float32) + b1, 0.0)
    h = jnp.maximum(
        jnp.dot(h.astype(jnp.bfloat16), w2.astype(jnp.bfloat16),
                preferred_element_type=jnp.float32) + b2, 0.0)
    logits = jnp.dot(h.astype(jnp.bfloat16), w3.astype(jnp.bfloat16),
                     preferred_element_type=jnp.float32) + b3
    return jax.nn.log_softmax(logits, axis=-1)


if __name__ == "__main__":
    key = jax.random.PRNGKey(0)
    key, kx1, kx2 = jax.random.split(key, 3)
    params = init_params(key)

    # Small test batches: one tile-aligned, one exercising the tail-padding path.
    for n, kx in ((8, kx1), (13, kx2)):
        x = jax.random.normal(kx, (n, 1, 28, 28), jnp.float32)
        out = jax.block_until_ready(fc3_forward(x, params))
        ref = _reference(x, params)
        assert out.shape == (n, _OUT)
        assert jnp.allclose(out, ref, atol=1e-2, rtol=1e-2), "mismatch vs JAX reference"
        # log_softmax rows must (approximately) sum to 1 in prob space
        assert jnp.allclose(jnp.sum(jnp.exp(out), axis=-1), 1.0, atol=1e-3)

    print("KERNEL_OK")
</pallas_src>

<mosaic_0001>
module attributes {stable_mosaic.version = 11 : i64} {
  func.func @_mlp_kernel(%arg0: i32, %arg1: memref<8x784xbf16, #tpu.memory_space<vmem>>, %arg2: memref<784x128xbf16, #tpu.memory_space<vmem>>, %arg3: memref<1x128xf32, #tpu.memory_space<vmem>>, %arg4: memref<128x128xbf16, #tpu.memory_space<vmem>>, %arg5: memref<1x128xf32, #tpu.memory_space<vmem>>, %arg6: memref<128x128xbf16, #tpu.memory_space<vmem>>, %arg7: memref<1x128xf32, #tpu.memory_space<vmem>>, %arg8: memref<8x128xf32, #tpu.memory_space<vmem>>) attributes {dimension_semantics = [#tpu.dimension_semantics<parallel>], iteration_bounds = array<i64: 1>, scalar_prefetch = 0 : i64, scratch_operands = 0 : i64, tpu.core_type = #tpu.core_type<tc>, window_params = [{transform_indices = @transform_0, window_bounds = array<i64: 8, 784>}, {pipeline_mode = #tpu.pipeline_mode<synchronous>, transform_indices = @transform_1, window_bounds = array<i64: 784, 128>}, {pipeline_mode = #tpu.pipeline_mode<synchronous>, transform_indices = @transform_2, window_bounds = array<i64: 1, 128>}, {pipeline_mode = #tpu.pipeline_mode<synchronous>, transform_indices = @transform_3, window_bounds = array<i64: 128, 128>}, {pipeline_mode = #tpu.pipeline_mode<synchronous>, transform_indices = @transform_4, window_bounds = array<i64: 1, 128>}, {pipeline_mode = #tpu.pipeline_mode<synchronous>, transform_indices = @transform_5, window_bounds = array<i64: 128, 128>}, {pipeline_mode = #tpu.pipeline_mode<synchronous>, transform_indices = @transform_6, window_bounds = array<i64: 1, 128>}, {transform_indices = @transform_7, window_bounds = array<i64: 8, 128>}]} {
    %c0 = arith.constant 0 : index
    %c0_0 = arith.constant 0 : index
    %0 = vector.load %arg1[%c0, %c0_0] : memref<8x784xbf16, #tpu.memory_space<vmem>>, vector<8x784xbf16>
    %c0_1 = arith.constant 0 : index
    %c0_2 = arith.constant 0 : index
    %1 = vector.load %arg2[%c0_1, %c0_2] : memref<784x128xbf16, #tpu.memory_space<vmem>>, vector<784x128xbf16>
    %cst = arith.constant dense<0.000000e+00> : vector<8x128xf32>
    %2 = tpu.matmul %0, %1, %cst {dimension_numbers = #tpu.dot_dimension_numbers<[1], [0], [0], [1], [0, 0, 1, 1], [], []>} : vector<8x784xbf16>, vector<784x128xbf16>, vector<8x128xf32> -> vector<8x128xf32>
    %c0_3 = arith.constant 0 : index
    %c0_4 = arith.constant 0 : index
    %3 = vector.load %arg3[%c0_3, %c0_4] : memref<1x128xf32, #tpu.memory_space<vmem>>, vector<1x128xf32>
    %4 = vector.broadcast %3 : vector<1x128xf32> to vector<8x128xf32>
    %5 = arith.addf %2, %4 : vector<8x128xf32>
    %cst_5 = arith.constant 0.000000e+00 : f32
    %6 = vector.broadcast %cst_5 : f32 to vector<8x128xf32>
    %7 = arith.maximumf %5, %6 : vector<8x128xf32>
    %8 = arith.truncf %7 : vector<8x128xf32> to vector<8x128xbf16>
    %c0_6 = arith.constant 0 : index
    %c0_7 = arith.constant 0 : index
    %9 = vector.load %arg4[%c0_6, %c0_7] : memref<128x128xbf16, #tpu.memory_space<vmem>>, vector<128x128xbf16>
    %cst_8 = arith.constant dense<0.000000e+00> : vector<8x128xf32>
    %10 = tpu.matmul %8, %9, %cst_8 {dimension_numbers = #tpu.dot_dimension_numbers<[1], [0], [0], [1], [0, 0, 1, 1], [], []>} : vector<8x128xbf16>, vector<128x128xbf16>, vector<8x128xf32> -> vector<8x128xf32>
    %c0_9 = arith.constant 0 : index
    %c0_10 = arith.constant 0 : index
    %11 = vector.load %arg5[%c0_9, %c0_10] : memref<1x128xf32, #tpu.memory_space<vmem>>, vector<1x128xf32>
    %12 = vector.broadcast %11 : vector<1x128xf32> to vector<8x128xf32>
    %13 = arith.addf %10, %12 : vector<8x128xf32>
    %cst_11 = arith.constant 0.000000e+00 : f32
    %14 = vector.broadcast %cst_11 : f32 to vector<8x128xf32>
    %15 = arith.maximumf %13, %14 : vector<8x128xf32>
    %16 = arith.truncf %15 : vector<8x128xf32> to vector<8x128xbf16>
    %c0_12 = arith.constant 0 : index
    %c0_13 = arith.constant 0 : index
    %17 = vector.load %arg6[%c0_12, %c0_13] : memref<128x128xbf16, #tpu.memory_space<vmem>>, vector<128x128xbf16>
    %cst_14 = arith.constant dense<0.000000e+00> : vector<8x128xf32>
    %18 = tpu.matmul %16, %17, %cst_14 {dimension_numbers = #tpu.dot_dimension_numbers<[1], [0], [0], [1], [0, 0, 1, 1], [], []>} : vector<8x128xbf16>, vector<128x128xbf16>, vector<8x128xf32> -> vector<8x128xf32>
    %c0_15 = arith.constant 0 : index
    %c0_16 = arith.constant 0 : index
    %19 = vector.load %arg7[%c0_15, %c0_16] : memref<1x128xf32, #tpu.memory_space<vmem>>, vector<1x128xf32>
    %20 = vector.broadcast %19 : vector<1x128xf32> to vector<8x128xf32>
    %21 = arith.addf %18, %20 : vector<8x128xf32>
    %cst_17 = arith.constant dense<0xFF800000> : vector<8xf32>
    %22 = vector.multi_reduction <maximumf>, %21, %cst_17 [1] : vector<8x128xf32> to vector<8xf32>
    %23 = vector.shape_cast %22 : vector<8xf32> to vector<8x1xf32>
    %24 = vector.broadcast %23 : vector<8x1xf32> to vector<8x128xf32>
    %25 = arith.subf %21, %24 : vector<8x128xf32>
    %26 = math.exp %25 : vector<8x128xf32>
    %cst_18 = arith.constant dense<0.000000e+00> : vector<8xf32>
    %27 = vector.multi_reduction <add>, %26, %cst_18 [1] : vector<8x128xf32> to vector<8xf32>
    %28 = vector.shape_cast %27 : vector<8xf32> to vector<8x1xf32>
    %29 = math.log %28 : vector<8x1xf32>
    %30 = vector.broadcast %29 : vector<8x1xf32> to vector<8x128xf32>
    %31 = arith.subf %25, %30 : vector<8x128xf32>
    %c0_19 = arith.constant 0 : index
    %c0_20 = arith.constant 0 : index
    %32 = vector.load %arg8[%c0_19, %c0_20] : memref<8x128xf32, #tpu.memory_space<vmem>>, vector<8x128xf32>
    tpu.vector_store %arg8[%c0_19, %c0_20], %31 {strides = array<i32>} : memref<8x128xf32, #tpu.memory_space<vmem>>, vector<8x128xf32>,
    return
  }
  func.func @transform_0(%arg0: i32) -> (i32, i32) {
    %c0_i32 = arith.constant 0 : i32
    %c0_i32_0 = arith.constant 0 : i32
    return %arg0, %c0_i32 : i32, i32
  }
  func.func @transform_1(%arg0: i32) -> (i32, i32) {
    %c0_i32 = arith.constant 0 : i32
    %c0_i32_0 = arith.constant 0 : i32
    %c0_i32_1 = arith.constant 0 : i32
    return %c0_i32, %c0_i32_0 : i32, i32
  }
  func.func @transform_2(%arg0: i32) -> (i32, i32) {
    %c0_i32 = arith.constant 0 : i32
    %c0_i32_0 = arith.constant 0 : i32
    %c0_i32_1 = arith.constant 0 : i32
    return %c0_i32, %c0_i32_0 : i32, i32
  }
  func.func @transform_3(%arg0: i32) -> (i32, i32) {
    %c0_i32 = arith.constant 0 : i32
    %c0_i32_0 = arith.constant 0 : i32
    %c0_i32_1 = arith.constant 0 : i32
    return %c0_i32, %c0_i32_0 : i32, i32
  }
  func.func @transform_4(%arg0: i32) -> (i32, i32) {
    %c0_i32 = arith.constant 0 : i32
    %c0_i32_0 = arith.constant 0 : i32
    %c0_i32_1 = arith.constant 0 : i32
    return %c0_i32, %c0_i32_0 : i32, i32
  }
  func.func @transform_5(%arg0: i32) -> (i32, i32) {
    %c0_i32 = arith.constant 0 : i32
    %c0_i32_0 = arith.constant 0 : i32
    %c0_i32_1 = arith.constant 0 : i32
    return %c0_i32, %c0_i32_0 : i32, i32
  }
  func.func @transform_6(%arg0: i32) -> (i32, i32) {
    %c0_i32 = arith.constant 0 : i32
    %c0_i32_0 = arith.constant 0 : i32
    %c0_i32_1 = arith.constant 0 : i32
    return %c0_i32, %c0_i32_0 : i32, i32
  }
  func.func @transform_7(%arg0: i32) -> (i32, i32) {
    %c0_i32 = arith.constant 0 : i32
    %c0_i32_0 = arith.constant 0 : i32
    return %arg0, %c0_i32 : i32, i32
  }
}

</mosaic_0001>

<bundles_post_ra>
// kernel: fc3_forward.1
= control target key start
LH: loop header
LB: loop body
LE: loop exit
PB: predicated region body
PF: predicated region fallthrough
CT: control target
= control target key end

     0   :  { %v1181_v43 = vmov 0.0   ;;  %vm1182_vm0 = vmmov 0   ;;  %vm455_vm1 = vcmask 130048   ;;  %s1475_s0 = inlined_call_operand.vmem [shape: bf16[8,784], index: 0, kind: input, shape index: {}]   ;;  %s1476_s1 = inlined_call_operand.vmem [shape: bf16[784,128], index: 1, kind: input, shape index: {}]   ;;  %s1477_s2 = inlined_call_operand.vmem [shape: f32[1,128], index: 2, kind: input, shape index: {}]   ;;  %s1478_s3 = inlined_call_operand.vmem [shape: bf16[128,128], index: 3, kind: input, shape index: {}]   ;;  %s1479_s4 = inlined_call_operand.vmem [shape: f32[1,128], index: 4, kind: input, shape index: {}]   ;;  %s1480_s5 = inlined_call_operand.vmem [shape: bf16[128,128], index: 5, kind: input, shape index: {}]   ;;  %s1481_s6 = inlined_call_operand.vmem [shape: f32[1,128], index: 6, kind: input, shape index: {}]   ;;  %s1482_s7 = inlined_call_operand.hbm [shape: f32[8,128], index: 7, kind: output, shape index: {}]  }
   0x1   :  { %v1081_v0 = vld [vmem:[%s1476_s1 + $0x40] sm:$0xff]   ;;  %v1085_v4 = vld [vmem:[%s1476_s1 + $0x48] sm:$0xff]   ;;  %v1089_v8 = vld [vmem:[%s1476_s1 + $0x50] sm:$0xff]  }
   0x2   :  { %v1082_v1 = vld [vmem:[%s1476_s1] sm:$0xff]   ;;  %946 = vmatprep.subr.bf16.mxu0 %v1081_v0  ;;  %v1086_v5 = vld [vmem:[%s1476_s1 + $0x8] sm:$0xff]   ;;  %v1090_v9 = vld [vmem:[%s1476_s1 + $0x10] sm:$0xff]  }
   0x3   :  { %v1083_v2 = vld [vmem:[%s1476_s1 + $0xc0] sm:$0xff]   ;;  %947 = vmatpush3.bf16.msra.mxu0 %v1082_v1  ;;  %v1087_v6 = vld [vmem:[%s1476_s1 + $0xc8] sm:$0xff]   ;;  %v1091_v10 = vld [vmem:[%s1476_s1 + $0xd0] sm:$0xff]  }
   0x4   :  { %v1084_v3 = vld [vmem:[%s1476_s1 + $0x80] sm:$0xff]   ;;  %968 = vmatprep.subr.bf16.mxu1 %v1083_v2  ;;  %948 = vmatprep.subr.bf16.mxu0 %v1085_v4  ;;  %v1088_v7 = vld [vmem:[%s1476_s1 + $0x88] sm:$0xff]   ;;  %v1092_v11 = vld [vmem:[%s1476_s1 + $0x90] sm:$0xff]  }
   0x5   :  { %969 = vmatpush3.bf16.msra.mxu1 %v1084_v3  ;;  %v1093_v12 = vld [vmem:[%s1476_s1 + $0x58] sm:$0xff]   ;;  %v1097_v16 = vld [vmem:[%s1476_s1 + $0x60] sm:$0xff]   ;;  %v1101_v20 = vld [vmem:[%s1476_s1 + $0x68] sm:$0xff]  }
   0x6   :  { %970 = vmatprep.subr.bf16.mxu1 %v1087_v6  ;;  %v1094_v13 = vld [vmem:[%s1476_s1 + $0x18] sm:$0xff]   ;;  %v1098_v17 = vld [vmem:[%s1476_s1 + $0x20] sm:$0xff]   ;;  %v1102_v21 = vld [vmem:[%s1476_s1 + $0x28] sm:$0xff]  }
   0x7   :  { %949 = vmatpush3.bf16.msra.mxu0 %v1086_v5  ;;  %v1095_v14 = vld [vmem:[%s1476_s1 + $0xd8] sm:$0xff]   ;;  %v1099_v18 = vld [vmem:[%s1476_s1 + $0xe0] sm:$0xff]   ;;  %v1103_v22 = vld [vmem:[%s1476_s1 + $0xe8] sm:$0xff]  }
   0x8   :  { %950 = vmatprep.subr.bf16.mxu0 %v1089_v8  ;;  %v1096_v15 = vld [vmem:[%s1476_s1 + $0x98] sm:$0xff]   ;;  %v1100_v19 = vld [vmem:[%s1476_s1 + $0xa0] sm:$0xff]   ;;  %v1104_v23 = vld [vmem:[%s1476_s1 + $0xa8] sm:$0xff]  }
   0x9   :  { %971 = vmatpush3.bf16.msra.mxu1 %v1088_v7  ;;  %v1105_v24 = vld [vmem:[%s1476_s1 + $0x70] sm:$0xff]   ;;  %v1109_v28 = vld [vmem:[%s1476_s1 + $0x78] sm:$0xff]   ;;  %v28_v31 = vld [vmem:[%s1475_s0] sm:$0xff] }
   0xa   :  { %972 = vmatprep.subr.bf16.mxu1 %v1091_v10  ;;  %v1106_v25 = vld [vmem:[%s1476_s1 + $0x30] sm:$0xff]   ;;  %v1110_v29 = vld [vmem:[%s1476_s1 + $0x38] sm:$0xff]   ;;  %v871_v32 = vcombine.low %v28_v31, %v28_v31  ;;  %v872_v33 = vcombine.high %v28_v31, %v28_v31  ;;  %v1115_v35 = vld [vmem:[%s1476_s1 + $0x140] sm:$0xff]  }
   0xb   :  { %951 = vmatpush3.bf16.msra.mxu0 %v1090_v9  ;;  %v1107_v26 = vld [vmem:[%s1476_s1 + $0xf0] sm:$0xff]   ;;  %v1111_v30 = vld [vmem:[%s1476_s1 + $0xf8] sm:$0xff]   ;;  %v29_v36 = vld [vmem:[%s1475_s0 + $0x8] sm:$0xff] }
   0xc   :  { %952 = vmatprep.subr.bf16.mxu0 %v1093_v12  ;;  %v1108_v27 = vld [vmem:[%s1476_s1 + $0xb0] sm:$0xff]   ;;  %v1114_v34 = vld [vmem:[%s1476_s1 + $0xb8] sm:$0xff]   ;;  %491 = vmatprep.mubr.bf16.mxu0 %v872_v33  ;;  %v873_v37 = vcombine.low %v29_v36, %v29_v36  ;;  %v874_v38 = vcombine.high %v29_v36, %v29_v36  ;;  %v1118_v39 = vld [vmem:[%s1476_s1 + $0x100] sm:$0xff]  }
   0xd   :  { %973 = vmatpush3.bf16.msra.mxu1 %v1092_v11  ;;  %v1119_v40 = vld [vmem:[%s1476_s1 + $0x148] sm:$0xff]   ;;  %v1121_v42 = vld [vmem:[%s1476_s1 + $0x150] sm:$0xff]   ;;  %v1123_v45 = vld [vmem:[%s1476_s1 + $0x158] sm:$0xff]  }
   0xe   :  { %974 = vmatprep.subr.bf16.mxu1 %v1095_v14  ;;  %531 = vmatprep.mubr.bf16.mxu1 %v874_v38  ;;  %v1120_v41 = vld [vmem:[%s1476_s1 + $0x108] sm:$0xff]   ;;  %v1122_v44 = vld [vmem:[%s1476_s1 + $0x110] sm:$0xff]   ;;  %v1124_v46 = vld [vmem:[%s1476_s1 + $0x118] sm:$0xff]  }
   0xf   :  { %953 = vmatpush3.bf16.msra.mxu0 %v1094_v13  ;;  %v1125_v47 = vld [vmem:[%s1476_s1 + $0x160] sm:$0xff]   ;;  %v1127_v49 = vld [vmem:[%s1476_s1 + $0x168] sm:$0xff]   ;;  %v30_v51 = vld [vmem:[%s1475_s0 + $0x10] sm:$0xff] }
  0x10   :  { %954 = vmatprep.subr.bf16.mxu0 %v1097_v16  ;;  %v1126_v48 = vld [vmem:[%s1476_s1 + $0x120] sm:$0xff]   ;;  %v1128_v52 = vld [vmem:[%s1476_s1 + $0x128] sm:$0xff]   ;;  %v876_v53 = vcombine.high %v30_v51, %v30_v51  ;;  %v1136_v54 = vld [vmem:[%s1475_s0 + $0x18] ss:$0 sps:$4 sm:$0xff]  }
  0x11   :  { %975 = vmatpush3.bf16.msra.mxu1 %v1096_v15  ;;  %v1133_v50 = vld [vmem:[%s1476_s1 + $0x180] sm:$0xff]   ;;  %v1129_v55 = vld [vmem:[%s1476_s1 + $0x170] sm:$0xff]   ;;  %v1131_v57 = vld [vmem:[%s1476_s1 + $0x178] sm:$0xff]  }
  0x12   :  { %976 = vmatprep.subr.bf16.mxu1 %v1099_v18  ;;  %v1130_v56 = vld [vmem:[%s1476_s1 + $0x130] sm:$0xff]   ;;  %v1132_v58 = vld [vmem:[%s1476_s1 + $0x138] sm:$0xff]  }
  0x13   :  { %955 = vmatpush3.bf16.msra.mxu0 %v1098_v17 }
  0x14   :  { %956 = vmatprep.subr.bf16.mxu0 %v1101_v20 }
  0x15   :  { %977 = vmatpush3.bf16.msra.mxu1 %v1100_v19 }
  0x16   :  { %978 = vmatprep.subr.bf16.mxu1 %v1103_v22 }
  0x17   :  { %957 = vmatpush3.bf16.msra.mxu0 %v1102_v21 }
  0x18   :  { %958 = vmatprep.subr.bf16.mxu0 %v1105_v24 }
  0x19   :  { %979 = vmatpush3.bf16.msra.mxu1 %v1104_v23 }
  0x1a   :  { %980 = vmatprep.subr.bf16.mxu1 %v1107_v26 }
  0x1b   :  { %959 = vmatpush3.bf16.msra.mxu0 %v1106_v25 }
  0x1c   :  { %960 = vmatprep.subr.bf16.mxu0 %v1109_v28 }
  0x1d   :  { %981 = vmatpush3.bf16.msra.mxu1 %v1108_v27 }
  0x1e   :  { %982 = vmatprep.subr.bf16.mxu1 %v1111_v30 }
  0x1f   :  { %961 = vmatpush3.bf16.msra.mxu0 %v1110_v29 }
  0x20   :  { %990 = vmatprep.subr.bf16.mxu0 %v1115_v35 }
  0x21   :  { %983 = vmatpush3.bf16.msra.mxu1 %v1114_v34 }
  0x22   :  { %492 = vmatmul.mubr.bf16.vlgmr.msra.gmra.mrb[0].mxu0 %v871_v32  ;;  %1032 = vmatprep.subr.bf16.mxu1 %v1181_v43 }
  0x23   :  { %991 = vmatpush3.bf16.msra.mxu0 %v1118_v39  ;;  %571 = vmatprep.mubr.bf16.mxu0 %v876_v53 }
  0x24   :  { %532 = vmatmul.mubr.bf16.vlgmr.msra.gmra.mrb[0].mxu1 %v873_v37  ;;  %992 = vmatprep.subr.bf16.mxu0 %v1119_v40 }
  0x25   :  { %1034 = vmatprep.mubr.msk.bf16.mxu1 %vm1182_vm0, %v1181_v43  ;;  %1033 = vmatpush3.bf16.msra.mxu1 %v1133_v50 }
  0x26   :  { %1038 = vmatprep.subr.bf16.mxu1 %v1181_v43 }
  0x27   :  { %993 = vmatpush3.bf16.msra.mxu0 %v1120_v41 }
  0x28   :  { %994 = vmatprep.subr.bf16.mxu0 %v1121_v42 }
  0x2b   :  { %995 = vmatpush3.bf16.msra.mxu0 %v1122_v44 }
  0x2c   :  { %996 = vmatprep.subr.bf16.mxu0 %v1123_v45  ;;  %1035 = vmatmul.mubr.msk.bf16.vlgmr.msra.gmra.mrb[4].mxu1 %vm455_vm1, %v1136_v54 }
  0x2d   :  { %1054 = vmatprep.mubr.msk.bf16.mxu1 %vm1182_vm0, %v1181_v43 }
  0x2f   :  { %997 = vmatpush3.bf16.msra.mxu0 %v1124_v46 }
  0x30   :  { %998 = vmatprep.subr.bf16.mxu0 %v1125_v47 }
  0x33   :  { %999 = vmatpush3.bf16.msra.mxu0 %v1126_v48 }
  0x34   :  { %1000 = vmatprep.subr.bf16.mxu0 %v1127_v49 }
  0x37   :  { %1001 = vmatpush3.bf16.msra.mxu0 %v1128_v52 }
  0x38   :  { %1002 = vmatprep.subr.bf16.mxu0 %v1129_v55 }
  0x3b   :  { %1003 = vmatpush3.bf16.msra.mxu0 %v1130_v56 }
  0x3c   :  { %1004 = vmatprep.subr.bf16.mxu0 %v1131_v57 }
  0x3d   :  { %12 = vsyncpa [#allocation3], 0  ;;  %v875_v59 = vcombine.low %v30_v51, %v30_v51  ;;  %v1137_v60 = vld [vmem:[%s1478_s3] sm:$0xff]   ;;  %v1138_v61 = vld [vmem:[%s1478_s3 + $0x8] sm:$0xff]  }
  0x3e   :  { %1039 = vmatpush3.bf16.msra.mxu1 %v1137_v60  ;;  %v1139_v62 = vld [vmem:[%s1478_s3 + $0x10] sm:$0xff]   ;;  %v1140_v63 = vld [vmem:[%s1478_s3 + $0x18] sm:$0xff]   ;;  %v1141_v0 = vld [vmem:[%s1478_s3 + $0x20] sm:$0xff]  }
  0x3f   :  { %1005 = vmatpush3.bf16.msra.mxu0 %v1132_v58  ;;  %1040 = vmatprep.subr.bf16.mxu1 %v1181_v43  ;;  %v1142_v1 = vld [vmem:[%s1478_s3 + $0x28] sm:$0xff]   ;;  %v1143_v2 = vld [vmem:[%s1478_s3 + $0x30] sm:$0xff]   ;;  %v1144_v3 = vld [vmem:[%s1478_s3 + $0x38] sm:$0xff]  }
  0x40   :  { %1058 = vmatprep.subr.bf16.mxu0 %v1181_v43  ;;  %v1145_v4 = vld [vmem:[%s1480_s5] sm:$0xff]   ;;  %v1146_v5 = vld [vmem:[%s1480_s5 + $0x8] sm:$0xff]   ;;  %v1147_v6 = vld [vmem:[%s1480_s5 + $0x10] sm:$0xff]  }
  0x41   :  { %v1148_v7 = vld [vmem:[%s1480_s5 + $0x18] sm:$0xff]   ;;  %v1149_v8 = vld [vmem:[%s1480_s5 + $0x20] sm:$0xff]   ;;  %v1150_v9 = vld [vmem:[%s1480_s5 + $0x28] sm:$0xff]  }
  0x42   :  { %572 = vmatmul.mubr.bf16.vlgmr.msra.gmra.mrb[4].mxu0 %v875_v59  ;;  %1041 = vmatpush3.bf16.msra.mxu1 %v1138_v61  ;;  %v870_v11 = vld [vmem:[%s1477_s2] ss:$0 sm:$0xff]  ;;  %v1151_v36 = vld [vmem:[%s1480_s5 + $0x30] sm:$0xff]   ;;  %v1152_v37 = vld [vmem:[%s1480_s5 + $0x38] sm:$0xff]  }
  0x43   :  { %1074 = vmatprep.mubr.msk.bf16.mxu0 %vm1182_vm0, %v1181_v43  ;;  %1042 = vmatprep.subr.bf16.mxu1 %v1181_v43  ;;  %v928_v38 = vld [vmem:[%s1479_s4] ss:$0 sm:$0xff]  ;;  %s1183_s4 = smov [#allocation2]  }
  0x44   :  { %1059 = vmatpush3.bf16.msra.mxu0 %v1145_v4  ;;  %s862_s5 = sshll.u32 %s1183_s4, 4  ;;  %s863_s5 = int_to_ptr.vmem [resolvable:$true] %s862_s5 }
  0x45   :  { %1060 = vmatprep.subr.bf16.mxu0 %v1181_v43  ;;  %p1162_p1 = scmp.lt.s32.totalorder %s863_s5, %s863_s5 }
  0x46   :  { %1043 = vmatpush3.bf16.msra.mxu1 %v1139_v62 }
  0x47   :  { %1044 = vmatprep.subr.bf16.mxu1 %v1181_v43 }
  0x48   :  { %1061 = vmatpush3.bf16.msra.mxu0 %v1146_v5 }
  0x49   :  { %1062 = vmatprep.subr.bf16.mxu0 %v1181_v43 }
  0x4a   :  { %1045 = vmatpush3.bf16.msra.mxu1 %v1140_v63 }
  0x4b   :  { %1046 = vmatprep.subr.bf16.mxu1 %v1181_v43 }
  0x4c   :  { %1063 = vmatpush3.bf16.msra.mxu0 %v1147_v6 }
  0x4d   :  { %1064 = vmatprep.subr.bf16.mxu0 %v1181_v43 }
  0x4e   :  { %1047 = vmatpush3.bf16.msra.mxu1 %v1141_v0 }
  0x4f   :  { %1048 = vmatprep.subr.bf16.mxu1 %v1181_v43 }
  0x50   :  { %1065 = vmatpush3.bf16.msra.mxu0 %v1148_v7 }
  0x51   :  { %1066 = vmatprep.subr.bf16.mxu0 %v1181_v43 }
  0x52   :  { %1049 = vmatpush3.bf16.msra.mxu1 %v1142_v1 }
  0x53   :  { %1050 = vmatprep.subr.bf16.mxu1 %v1181_v43 }
  0x54   :  { %1067 = vmatpush3.bf16.msra.mxu0 %v1149_v8 }
  0x55   :  { %1068 = vmatprep.subr.bf16.mxu0 %v1181_v43 }
  0x56   :  { %1051 = vmatpush3.bf16.msra.mxu1 %v1143_v2 }
  0x57   :  { %1052 = vmatprep.subr.bf16.mxu1 %v1181_v43 }
  0x58   :  { %1069 = vmatpush3.bf16.msra.mxu0 %v1150_v9 }
  0x59   :  { %1070 = vmatprep.subr.bf16.mxu0 %v1181_v43 }
  0x5a   :  { %1053 = vmatpush3.bf16.msra.mxu1 %v1144_v3 }
  0x5c   :  { %1071 = vmatpush3.bf16.msra.mxu0 %v1151_v36 }
  0x5d   :  { %1072 = vmatprep.subr.bf16.mxu0 %v1181_v43  ;;  %v937_v43 = vld [vmem:[%s1481_s6] ss:$0 sm:$0xff]  ;;  %s1157_s6 = scalar_lea.vmem %s863_s5, 128 }
  0x5e   :  { %p1158_p0 = scmp.ne.s32.totalorder %s863_s5, %s1157_s6  ;;  %p1163_p2 = scmp.lt.s32.totalorder %s1157_s6, %s1157_s6 }
  0x60   :  { %1073 = vmatpush3.bf16.msra.mxu0 %v1152_v37  ;;  %p1164_p3 = por %p1163_p2, %p1162_p1 }
  0x62   :  { %p1165_p4 = pnand %p1164_p3, %p1158_p0 }
  0xf5   :  { %v962_v10 = vpop.f32.mrb[0].mxu0 }
  0xf6   :  { %v963_v12 = vpop.f32.mrb[1].mxu0 }
  0xf7   :  { %v964_v13 = vadd.f32 %v963_v12, %v962_v10  ;;  %v965_v14 = vpop.f32.mrb[2].mxu0  ;;  %v984_v15 = vpop.f32.mrb[0].mxu1 }
  0xf8   :  { %v966_v16 = vpop.f32.mrb[3].mxu0  ;;  %v985_v17 = vpop.f32.mrb[1].mxu1 }
  0xf9   :  { %v494_v18 = vadd.f32 %v964_v13, %v870_v11  ;;  %v986_v19 = vadd.f32 %v985_v17, %v984_v15  ;;  %v987_v20 = vpop.f32.mrb[2].mxu1 }
  0xfa   :  { %v988_v21 = vpop.f32.mrb[3].mxu1 }
  0xfb   :  { %v534_v22 = vadd.f32 %v986_v19, %v494_v18 }
  0xff   :  { %v613_v23 = vpop.f32.mrb[4].mxu1 }
 0x100   :  { %v1036_v24 = vpop.f32.mrb[5].mxu1 }
 0x101   :  { %v616_v25 = vpop.f32.mrb[6].mxu1 }
 0x102   :  { %v1037_v26 = vpop.f32.mrb[7].mxu1 }
 0x115   :  { %v1006_v27 = vpop.f32.mrb[4].mxu0 }
 0x116   :  { %v1007_v28 = vpop.f32.mrb[5].mxu0 }
 0x117   :  { %v1008_v29 = vadd.f32 %v1007_v28, %v1006_v27  ;;  %v1009_v30 = vpop.f32.mrb[6].mxu0 }
 0x118   :  { %v1010_v31 = vpop.f32.mrb[7].mxu0 }
 0x119   :  { %v574_v32 = vadd.f32 %v1008_v29, %v534_v22 }
 0x11b   :  { %v614_v33 = vadd.f32 %v613_v23, %v574_v32 }
 0x11d   :  { %v619_v34 = vmax.f32 %v614_v33, 0.0 }
 0x11f   :  { %v620_v35 = vpack.c.bf16 %v619_v34, %v619_v34 }
 0x121   :  { %1055 = vmatmul.mubr.bf16.vlgmr.msra.gmra.mrb[8].mxu1 %v620_v35 }
 0x1f4   :  { %v726_v39 = vpop.f32.mrb[8].mxu1 }
 0x1f5   :  { %v727_v40 = vadd.f32 %v928_v38, %v726_v39  ;;  %v1056_v41 = vpop.f32.mrb[9].mxu1 }
 0x1f6   :  { %v729_v42 = vpop.f32.mrb[10].mxu1 }
 0x1f7   :  { %v732_v44 = vmax.f32 %v727_v40, 0.0  ;;  %v1057_v45 = vpop.f32.mrb[11].mxu1 }
 0x1f9   :  { %v733_v46 = vpack.c.bf16 %v732_v44, %v732_v44 }
 0x1fb   :  { %1075 = vmatmul.mubr.bf16.vlgmr.msra.gmra.mrb[8].mxu0 %v733_v46 }
 0x2ce   :  { %v839_v47 = vpop.f32.mrb[8].mxu0 }
 0x2cf   :  { %v840_v48 = vadd.f32 %v937_v43, %v839_v47  ;;  %v1076_v49 = vpop.f32.mrb[9].mxu0 }
 0x2d0   :  { %v842_v50 = vpop.f32.mrb[10].mxu0 }
 0x2d1   :  { %845 = vmax.xlane.f32.xlu0 %v840_v48  ;;  %v1077_v51 = vpop.f32.mrb[11].mxu0 }
 0x35e   :  { %v846_v52 = vpop.xlane.xlu0 %845 }
 0x35f   :  { %v847_v53 = vsub.f32 %v840_v48, %v846_v52 }
 0x361   :  { %v848_v54 = vmul.f32 1.442695, %v847_v53 }
 0x363   :  { %1153 = vpow2.f32 %v848_v54 }
 0x36d   :  { %v1154_v55 = vpop.eup %1153 }
 0x36e   :  { %850 = vadd.xlane.f32.xlu0 %v1154_v55 }
 0x3fb   :  { %v851_v56 = vpop.xlane.xlu0 %850 }
 0x3fc   :  { %1155 = vlog2.f32 %v851_v56 }
 0x406   :  { %v1156_v57 = vpop.eup %1155 }
 0x407   :  { %v853_v58 = vmul.f32 0.6931472, %v1156_v57 }
 0x409   :  { %v854_v59 = vsub.f32 %v847_v53, %v853_v58 }
 0x40b   :  { %855 = vst [vmem:[#allocation2] sm:$0xff] %v854_v59 }
 0x40c   :  { %1168 = shalt.err (!%p1165_p4)
}
 0x40d   :  { %s1169_s26 = scalar_lea.hbm %s1482_s7, 128 }
 0x40e   :  { %p1170_p5 = scmp.ne.s32.totalorder %s1482_s7, %s1169_s26  ;;  %p1173_p6 = scmp.lt.u32.totalorder %s1169_s26, %s1482_s7 }
 0x410   :  { %p1175_p7 = pnand %p1173_p6, %p1170_p5 }
 0x412   :  { %1178 = shalt.err (!%p1175_p7)
}
 0x413   :  { %865 = dma.vmem_to_hbm [thread:$0]  %s863_s5, 128, %s1482_s7, [#allocation3]  }
 0x414   :  { %1179 = dma.done.wait [#allocation3], 128  }
 0x415   :  { %1180 = vsyncadd [#allocation3], 4294967168 }
 0x416   :  { %869 = vsyncpa [#allocation3], 1 }

</bundles_post_ra>
